<compile_context>
chip_gen: v7x
topology: tpu7x:2x2x1
jax: 0.10.0
libtpu: 0.0.40
codegen_flags: <defaults>
</compile_context>

<pallas_src>
import functools

import jax
import jax.numpy as jnp
from jax.experimental import pallas as pl
from jax.experimental.pallas import tpu as pltpu


def _conv_same_flat_kernel(k_ref, x_ref, o_ref, *, ksize, w):
    """'Same' (zero-padded, odd-k) conv of the LAST input channel.

    One grid step == one output channel (the same plane is written to every
    channel, reproducing the reference module's last-channel-overwrite quirk).

    k_ref : (k, k)   f32 SMEM  -- conv taps, read as scalars
    x_ref : (N, H*W) f32 VMEM  -- last input channel, spatially flattened
    o_ref : (N, H*W) f32 VMEM  -- one output channel, spatially flattened
    """
    n, hw = x_ref.shape
    pad = ksize // 2
    ext = pad * w + pad                                   # max |flat tap offset|
    ext_a = ((ext + 127) // 128) * 128 if ext > 0 else 0  # 128-aligned extension

    # Hoist all k*k SMEM tap reads out of the MAC loop (no per-tap re-reads).
    taps = [[k_ref[dy, dx] for dx in range(ksize)] for dy in range(ksize)]

    x = x_ref[...]                                        # (N, H*W)

    # Zero-extended flat plane built in registers (no pad-scratch round-trip).
    # xe[:, m] == x[:, m - ext_a] inside the valid window, 0 outside, so a
    # static lane slice of xe is a shifted-with-zero-fill view of x.
    if ext_a > 0:
        zpad = jnp.zeros((n, ext_a), jnp.float32)
        xe = jnp.concatenate([zpad, x, zpad], axis=1)     # 128-aligned pieces
    else:
        xe = x

    # Destination-column index (period w along the flat axis) for the row-wrap
    # masks of horizontally shifted taps.  Hoisted out of the tap loop.
    col_mask = {}
    if ksize > 1:
        pos = jax.lax.broadcasted_iota(jnp.int32, (n, hw), 1)
        if (w & (w - 1)) == 0:                            # power-of-two fast path
            col = pos & (w - 1)
        else:
            col = jax.lax.rem(pos, w)
        for dx in range(ksize):
            ox = dx - pad
            if ox < 0:
                col_mask[ox] = col >= -ox
            elif ox > 0:
                col_mask[ox] = col < (w - ox)

    # k*k unrolled VPU multiply-accumulate, fully lane-dense.
    acc = jnp.zeros((n, hw), jnp.float32)
    for dy in range(ksize):
        oy = dy - pad
        for dx in range(ksize):
            ox = dx - pad
            off = oy * w + ox            # out[f] needs x[f + off] (zero if OOB)
            start = ext_a + off          # static, in [0, 2 * ext_a]
            shifted = xe[:, start:start + hw]
            if ox != 0:                  # zero positions that wrapped a row
                shifted = jnp.where(col_mask[ox], shifted, 0.0)
            acc = acc + taps[dy][dx] * shifted

    o_ref[...] = acc


def _conv_valid_kernel(k_ref, x_ref, o_ref, *, ksize):
    """'Valid' conv of the last channel of a (possibly pre-padded) image.

    k_ref : (k, k)        f32 SMEM
    x_ref : (N, Hin, Win) f32 VMEM
    o_ref : (N, Ho, Wo)   f32 VMEM  -- one output channel per grid step
    """
    n, ho, wo = o_ref.shape
    taps = [[k_ref[dy, dx] for dx in range(ksize)] for dy in range(ksize)]
    x = x_ref[...]
    acc = jnp.zeros((n, ho, wo), jnp.float32)
    for dy in range(ksize):
        for dx in range(ksize):
            acc = acc + taps[dy][dx] * x[:, dy:dy + ho, dx:dx + wo]
    o_ref[...] = acc


def conv_forward(image, kernel, *, stride=1, padding=True):
    """Faithful re-implementation of Conv.forward.

    Quirks reproduced on purpose (do NOT "fix"): only the LAST input channel is
    convolved and broadcast to all C output channels; `stride` is ignored.
    """
    del stride  # unused in the reference forward pass
    n, c, h, w = image.shape
    ksize = int(kernel.shape[0])
    img = image.astype(jnp.float32)
    kern = kernel.astype(jnp.float32)

    cparams = pltpu.CompilerParams(
        dimension_semantics=("parallel",),        # megacore shards C on v7x
        vmem_limit_bytes=32 * 1024 * 1024,
    )

    if padding and ksize % 2 == 1:
        # Main path ('same' conv, Ho==H, Wo==W): lane-dense flattened layout.
        hw = h * w
        # Free row-major reshapes.  The size-1 axis keeps the channel dim out
        # of the trailing (sublane, lane) pair, so per-channel blocks have
        # trailing block dims equal to the full array dims.
        x4 = img.reshape(n, c, 1, hw)
        out4 = pl.pallas_call(
            functools.partial(_conv_same_flat_kernel, ksize=ksize, w=w),
            out_shape=jax.ShapeDtypeStruct((n, c, 1, hw), jnp.float32),
            grid_spec=pltpu.PrefetchScalarGridSpec(
                num_scalar_prefetch=0,
                grid=(c,),                        # one output channel per step
                in_specs=[
                    # conv taps live in SMEM; read as scalars inside the body
                    pl.BlockSpec(memory_space=pltpu.MemorySpace.SMEM),
                    # Only channel c-1 contributes; constant block index ->
                    # DMA'd once, elided on revisits across the C grid steps.
                    pl.BlockSpec((n, pl.Squeezed(), pl.Squeezed(), hw),
                                 lambda ci: (0, c - 1, 0, 0)),
                ],
                out_specs=pl.BlockSpec((n, pl.Squeezed(), pl.Squeezed(), hw),
                                       lambda ci: (0, ci, 0, 0)),
            ),
            compiler_params=cparams,
        )(kern, x4)
        return out4.reshape(n, c, h, w)

    # Fallback path (padding=False, or even kernel sizes): straightforward
    # 'valid' conv on the (optionally wrapper-padded) last channel.
    # TODO(synk): lane-dense output repack + fused padding for this rare path.
    x_in = img[:, c - 1:c]                        # (N, 1, H, W): only channel used
    if padding:
        p = ksize // 2
        x_in = jnp.pad(x_in, ((0, 0), (0, 0), (p, p), (p, p)))
    hp, wp = x_in.shape[2], x_in.shape[3]
    ho, wo = hp - (ksize - 1), wp - (ksize - 1)
    return pl.pallas_call(
        functools.partial(_conv_valid_kernel, ksize=ksize),
        out_shape=jax.ShapeDtypeStruct((n, c, ho, wo), jnp.float32),
        grid_spec=pltpu.PrefetchScalarGridSpec(
            num_scalar_prefetch=0,
            grid=(c,),
            in_specs=[
                pl.BlockSpec(memory_space=pltpu.MemorySpace.SMEM),
                pl.BlockSpec((n, pl.Squeezed(), hp, wp),
                             lambda ci: (0, 0, 0, 0)),
            ],
            out_specs=pl.BlockSpec((n, pl.Squeezed(), ho, wo),
                                   lambda ci: (0, ci, 0, 0)),
        ),
        compiler_params=cparams,
    )(kern, x_in)


def _reference(image, kernel, padding=True):
    """Pure-JAX reference with identical (quirky) semantics, for verification."""
    n, c, h, w = image.shape
    ksize = kernel.shape[0]
    x = image[:, c - 1, :, :].astype(jnp.float32)
    if padding:
        p = ksize // 2
        x = jnp.pad(x, ((0, 0), (p, p), (p, p)))
    hp, wp = x.shape[1], x.shape[2]
    ho, wo = hp - (ksize - 1), wp - (ksize - 1)
    out = jnp.zeros((n, ho, wo), jnp.float32)
    for dy in range(ksize):
        for dx in range(ksize):
            out = out + kernel[dy, dx] * x[:, dy:dy + ho, dx:dx + wo]
    return jnp.broadcast_to(out[:, None], (n, c, ho, wo))


if __name__ == "__main__":
    key = jax.random.PRNGKey(0)
    k_img, k_kern = jax.random.split(key)

    N, C, H, W = 2, 4, 16, 16
    KSIZE = 3

    image = jax.random.normal(k_img, (N, C, H, W), dtype=jnp.float32)
    # PyTorch: torch.randint(0, 2, (k, k), dtype=torch.float)
    kernel = jax.random.randint(k_kern, (KSIZE, KSIZE), 0, 2).astype(jnp.float32)

    out = conv_forward(image, kernel, stride=1, padding=True)
    out = jax.block_until_ready(out)

    ref = _reference(image, kernel, padding=True)
    assert out.shape == ref.shape, (out.shape, ref.shape)
    assert jnp.allclose(out, ref, atol=1e-5, rtol=1e-5)

    print("KERNEL_OK")
</pallas_src>

<mosaic_0001>
module attributes {stable_mosaic.version = 11 : i64} {
  func.func @_conv_same_flat_kernel(%arg0: i32, %arg1: memref<3x3xf32, #tpu.memory_space<smem>>, %arg2: memref<2x1x1x256xf32, #tpu.memory_space<vmem>>, %arg3: memref<2x1x1x256xf32, #tpu.memory_space<vmem>>) attributes {dimension_semantics = [#tpu.dimension_semantics<parallel>], iteration_bounds = array<i64: 4>, scalar_prefetch = 0 : i64, scratch_operands = 0 : i64, tpu.core_type = #tpu.core_type<tc>, window_params = [{transform_indices = @transform_0, window_bounds = array<i64: 3, 3>}, {transform_indices = @transform_1, window_bounds = array<i64: 2, 1, 1, 256>}, {transform_indices = @transform_2, window_bounds = array<i64: 2, 1, 1, 256>}]} {
    %c0 = arith.constant 0 : index
    %c0_0 = arith.constant 0 : index
    %0 = memref.load %arg1[%c0, %c0_0] : memref<3x3xf32, #tpu.memory_space<smem>>
    %c0_1 = arith.constant 0 : index
    %c1 = arith.constant 1 : index
    %1 = memref.load %arg1[%c0_1, %c1] : memref<3x3xf32, #tpu.memory_space<smem>>
    %c0_2 = arith.constant 0 : index
    %c2 = arith.constant 2 : index
    %2 = memref.load %arg1[%c0_2, %c2] : memref<3x3xf32, #tpu.memory_space<smem>>
    %c1_3 = arith.constant 1 : index
    %c0_4 = arith.constant 0 : index
    %3 = memref.load %arg1[%c1_3, %c0_4] : memref<3x3xf32, #tpu.memory_space<smem>>
    %c1_5 = arith.constant 1 : index
    %c1_6 = arith.constant 1 : index
    %4 = memref.load %arg1[%c1_5, %c1_6] : memref<3x3xf32, #tpu.memory_space<smem>>
    %c1_7 = arith.constant 1 : index
    %c2_8 = arith.constant 2 : index
    %5 = memref.load %arg1[%c1_7, %c2_8] : memref<3x3xf32, #tpu.memory_space<smem>>
    %c2_9 = arith.constant 2 : index
    %c0_10 = arith.constant 0 : index
    %6 = memref.load %arg1[%c2_9, %c0_10] : memref<3x3xf32, #tpu.memory_space<smem>>
    %c2_11 = arith.constant 2 : index
    %c1_12 = arith.constant 1 : index
    %7 = memref.load %arg1[%c2_11, %c1_12] : memref<3x3xf32, #tpu.memory_space<smem>>
    %c2_13 = arith.constant 2 : index
    %c2_14 = arith.constant 2 : index
    %8 = memref.load %arg1[%c2_13, %c2_14] : memref<3x3xf32, #tpu.memory_space<smem>>
    %c0_15 = arith.constant 0 : index
    %c0_16 = arith.constant 0 : index
    %c0_17 = arith.constant 0 : index
    %c0_18 = arith.constant 0 : index
    %9 = vector.load %arg2[%c0_15, %c0_16, %c0_17, %c0_18] : memref<2x1x1x256xf32, #tpu.memory_space<vmem>>, vector<2x1x1x256xf32>
    %10 = vector.shape_cast %9 : vector<2x1x1x256xf32> to vector<2x256xf32>
    %cst = arith.constant 0.000000e+00 : f32
    %11 = vector.broadcast %cst : f32 to vector<2x128xf32>
    %12 = tpu.concatenate %11, %10, %11 in 1 : vector<2x128xf32>, vector<2x256xf32>, vector<2x128xf32> -> vector<2x512xf32>
    %13 = tpu.iota {dimensions = array<i32: 1>} : vector<2x256xi32>
    %c15_i32 = arith.constant 15 : i32
    %14 = vector.broadcast %c15_i32 : i32 to vector<2x256xi32>
    %15 = arith.andi %13, %14 : vector<2x256xi32>
    %c1_i32 = arith.constant 1 : i32
    %16 = vector.broadcast %c1_i32 : i32 to vector<2x256xi32>
    %17 = arith.cmpi sge, %15, %16 : vector<2x256xi32>
    %c15_i32_19 = arith.constant 15 : i32
    %18 = vector.broadcast %c15_i32_19 : i32 to vector<2x256xi32>
    %19 = arith.cmpi slt, %15, %18 : vector<2x256xi32>
    %cst_20 = arith.constant 0.000000e+00 : f32
    %20 = vector.broadcast %cst_20 : f32 to vector<2x256xf32>
    %21 = vector.extract_strided_slice %12 {offsets = [0, 111], sizes = [2, 256], strides = [1, 1]} : vector<2x512xf32> to vector<2x256xf32>
    %cst_21 = arith.constant 0.000000e+00 : f32
    %22 = vector.broadcast %cst_21 : f32 to vector<2x256xf32>
    %23 = arith.select %17, %21, %22 : vector<2x256xi1>, vector<2x256xf32>
    %24 = vector.broadcast %0 : f32 to vector<2x256xf32>
    %25 = arith.mulf %24, %23 : vector<2x256xf32>
    %26 = arith.addf %20, %25 : vector<2x256xf32>
    %27 = vector.extract_strided_slice %12 {offsets = [0, 112], sizes = [2, 256], strides = [1, 1]} : vector<2x512xf32> to vector<2x256xf32>
    %28 = vector.broadcast %1 : f32 to vector<2x256xf32>
    %29 = arith.mulf %28, %27 : vector<2x256xf32>
    %30 = arith.addf %26, %29 : vector<2x256xf32>
    %31 = vector.extract_strided_slice %12 {offsets = [0, 113], sizes = [2, 256], strides = [1, 1]} : vector<2x512xf32> to vector<2x256xf32>
    %cst_22 = arith.constant 0.000000e+00 : f32
    %32 = vector.broadcast %cst_22 : f32 to vector<2x256xf32>
    %33 = arith.select %19, %31, %32 : vector<2x256xi1>, vector<2x256xf32>
    %34 = vector.broadcast %2 : f32 to vector<2x256xf32>
    %35 = arith.mulf %34, %33 : vector<2x256xf32>
    %36 = arith.addf %30, %35 : vector<2x256xf32>
    %37 = vector.extract_strided_slice %12 {offsets = [0, 127], sizes = [2, 256], strides = [1, 1]} : vector<2x512xf32> to vector<2x256xf32>
    %cst_23 = arith.constant 0.000000e+00 : f32
    %38 = vector.broadcast %cst_23 : f32 to vector<2x256xf32>
    %39 = arith.select %17, %37, %38 : vector<2x256xi1>, vector<2x256xf32>
    %40 = vector.broadcast %3 : f32 to vector<2x256xf32>
    %41 = arith.mulf %40, %39 : vector<2x256xf32>
    %42 = arith.addf %36, %41 : vector<2x256xf32>
    %43 = vector.extract_strided_slice %12 {offsets = [0, 128], sizes = [2, 256], strides = [1, 1]} : vector<2x512xf32> to vector<2x256xf32>
    %44 = vector.broadcast %4 : f32 to vector<2x256xf32>
    %45 = arith.mulf %44, %43 : vector<2x256xf32>
    %46 = arith.addf %42, %45 : vector<2x256xf32>
    %47 = vector.extract_strided_slice %12 {offsets = [0, 129], sizes = [2, 256], strides = [1, 1]} : vector<2x512xf32> to vector<2x256xf32>
    %cst_24 = arith.constant 0.000000e+00 : f32
    %48 = vector.broadcast %cst_24 : f32 to vector<2x256xf32>
    %49 = arith.select %19, %47, %48 : vector<2x256xi1>, vector<2x256xf32>
    %50 = vector.broadcast %5 : f32 to vector<2x256xf32>
    %51 = arith.mulf %50, %49 : vector<2x256xf32>
    %52 = arith.addf %46, %51 : vector<2x256xf32>
    %53 = vector.extract_strided_slice %12 {offsets = [0, 143], sizes = [2, 256], strides = [1, 1]} : vector<2x512xf32> to vector<2x256xf32>
    %cst_25 = arith.constant 0.000000e+00 : f32
    %54 = vector.broadcast %cst_25 : f32 to vector<2x256xf32>
    %55 = arith.select %17, %53, %54 : vector<2x256xi1>, vector<2x256xf32>
    %56 = vector.broadcast %6 : f32 to vector<2x256xf32>
    %57 = arith.mulf %56, %55 : vector<2x256xf32>
    %58 = arith.addf %52, %57 : vector<2x256xf32>
    %59 = vector.extract_strided_slice %12 {offsets = [0, 144], sizes = [2, 256], strides = [1, 1]} : vector<2x512xf32> to vector<2x256xf32>
    %60 = vector.broadcast %7 : f32 to vector<2x256xf32>
    %61 = arith.mulf %60, %59 : vector<2x256xf32>
    %62 = arith.addf %58, %61 : vector<2x256xf32>
    %63 = vector.extract_strided_slice %12 {offsets = [0, 145], sizes = [2, 256], strides = [1, 1]} : vector<2x512xf32> to vector<2x256xf32>
    %cst_26 = arith.constant 0.000000e+00 : f32
    %64 = vector.broadcast %cst_26 : f32 to vector<2x256xf32>
    %65 = arith.select %19, %63, %64 : vector<2x256xi1>, vector<2x256xf32>
    %66 = vector.broadcast %8 : f32 to vector<2x256xf32>
    %67 = arith.mulf %66, %65 : vector<2x256xf32>
    %68 = arith.addf %62, %67 : vector<2x256xf32>
    %c0_27 = arith.constant 0 : index
    %c0_28 = arith.constant 0 : index
    %c0_29 = arith.constant 0 : index
    %c0_30 = arith.constant 0 : index
    %69 = vector.load %arg3[%c0_27, %c0_28, %c0_29, %c0_30] : memref<2x1x1x256xf32, #tpu.memory_space<vmem>>, vector<2x1x1x256xf32>
    %70 = vector.shape_cast %69 : vector<2x1x1x256xf32> to vector<2x256xf32>
    %71 = vector.shape_cast %68 : vector<2x256xf32> to vector<2x1x1x256xf32>
    tpu.vector_store %arg3[%c0_27, %c0_28, %c0_29, %c0_30], %71 {strides = array<i32>} : memref<2x1x1x256xf32, #tpu.memory_space<vmem>>, vector<2x1x1x256xf32>,
    return
  }
  func.func @transform_0(%arg0: i32) -> (i32, i32) {
    %c0_i32 = arith.constant 0 : i32
    %c0_i32_0 = arith.constant 0 : i32
    %c0_i32_1 = arith.constant 0 : i32
    return %c0_i32, %c0_i32_0 : i32, i32
  }
  func.func @transform_1(%arg0: i32) -> (i32, i32, i32, i32) {
    %c0_i32 = arith.constant 0 : i32
    %c3_i32 = arith.constant 3 : i32
    %c0_i32_0 = arith.constant 0 : i32
    %c0_i32_1 = arith.constant 0 : i32
    %c0_i32_2 = arith.constant 0 : i32
    return %c0_i32, %c3_i32, %c0_i32_0, %c0_i32_1 : i32, i32, i32, i32
  }
  func.func @transform_2(%arg0: i32) -> (i32, i32, i32, i32) {
    %c0_i32 = arith.constant 0 : i32
    %c0_i32_0 = arith.constant 0 : i32
    %c0_i32_1 = arith.constant 0 : i32
    %c0_i32_2 = arith.constant 0 : i32
    return %c0_i32, %arg0, %c0_i32_0, %c0_i32_1 : i32, i32, i32, i32
  }
}

</mosaic_0001>

<bundles_post_ra>
// kernel: tpu_custom_call.1
= control target key start
LH: loop header
LB: loop body
LE: loop exit
PB: predicated region body
PF: predicated region fallthrough
CT: control target
= control target key end

     0   :  { %7 = vsyncpa [#allocation5], 0  ;;  %s988_s0 = inlined_call_operand.hbm [shape: f32[3,3], index: 0, kind: input, shape index: {}]   ;;  %s989_s1 = inlined_call_operand.hbm [shape: f32[2,4,1,256], index: 1, kind: input, shape index: {}]   ;;  %s990_s2 = inlined_call_operand.hbm [shape: f32[2,4,1,256], index: 2, kind: output, shape index: {}]  }
   0x1   :  { %8 = vsyncpa [#allocation3], 0 }
   0x2   :  { %9 = vsyncpa [#allocation4], 0 }
   0x3   :  { %11 = vsyncpa [#allocation4 + $0x1], 0  ;;  %s720_s9 = smov 0   ;;  %s722_s10 = smov 0  }
   0x4   :  { %s724_s11 = smov 0   ;;  %s726_s12 = smov 0  }
   0x5 LB: > { %s741_s13 = sadd.s32 4294967295, %s684_s12   ;;  %s472_s14 = sadd.s32 4294967294, %s684_s12   ;;  %s684_s12 = sphi %s726_s12, %s1016_s12   ;;  %s680_s11 = sphi %s724_s11, %s1015_s11   ;;  %s676_s10 = sphi %s722_s10, %s1014_s10   ;;  %s672_s9 = sphi %s720_s9, %s1013_s9  }
   0x6   : > { %s745_s15 = sadd.s32 1, %s684_s12   ;;  %s66_s16 = sadd.s32 1, %s680_s11 }
   0x7   : > { %s63_s17 = ssub.s32 %s684_s12, %s745_s15  ;;  %p76_p0 = scmp.ne.s32.totalorder %s680_s11, %s676_s10 }
   0x8   : > { %p64_p1 = scmp.eq.s32.totalorder %s63_s17, 0  ;;  %p77_p2 = scmp.eq.s32.totalorder %s741_s13, 3 }
   0x9   : > { %p82_p3 = scmp.ne.s32.totalorder %s676_s10, %s672_s9  ;;  %p83_p4 = scmp.eq.s32.totalorder %s472_s14, 3 }
   0xa   : > { %s756_s18 = scalar_select %p64_p1, %s680_s11, %s66_s16  }
   0xb   : > { %p758_p5 = por %p77_p2, %p76_p0  ;;  %p762_p6 = por %p83_p4, %p82_p3 }
   0xc   : > { %p473_p7 = scmp.ge.s32.totalorder %s684_s12, 1  ;;  %p90_p8 = scmp.lt.s32.totalorder %s684_s12, 5 }
   0xd   : > { %s994_s19 = scalar_select %p758_p5, 1, 0 }
   0xe   : > { %s995_s20 = scalar_select %p762_p6, 1, 0 }
   0xf   : > { %p768_p9 = pnand %p473_p7, %p90_p8  ;;  %p991_p10 = scmp.eq.s32.totalorder %s741_s13, 0 }
  0x10   : > { %s686_s22 = smov [#allocation6]   ;;  %s778_s26 = scalar_lea.hbm %s989_s1, 96 }
  0x11   : > { %s996_s21 = scalar_select %p768_p9, 1, 0 }
  0x12   : > { %p504_p11 = pneg %p768_p9  ;;  %s112_s23 = sshll.u32 %s686_s22, 4  ;;  %s780_s23 = int_to_ptr.vmem [resolvable:$true] %s112_s23 }
  0x13   : > { %s570_s30 = scalar_lea.hbm %s988_s0, 64 }
  0x14   : > { %p784_p12 = pnand %p991_p10, %p504_p11  ;;  %p571_p13 = scmp.ne.s32.totalorder %s988_s0, %s570_s30 }
  0x15   : > { %p577_p3 = scmp.lt.u32.totalorder %s570_s30, %s988_s0 }
  0x16   : > { %p572_p0 = pneg %p784_p12 }
  0x18   : > { %p573_p1 = pnand %p572_p0, %p571_p13 }
  0x1a   : > { %p574_p2 = pneg %p573_p1 }
  0x1c   : > { %p579_p4 = pnand %p577_p3, %p574_p2 }
  0x1e   : > { %582 = shalt.err (!%p579_p4)
}
  0x1f   : > { %s687_s7 = smov [#allocation2]   ;;  %s613_s22 = scalar_lea.hbm %s989_s1, 160 }
  0x20   : > { %507 = dma.hbm_to_smem (!%p784_p12), %s988_s0, 64, %s687_s7, [#allocation5]  }
  0x21   : > { %p584_p7 = scmp.ne.s32.totalorder %s778_s26, %s613_s22  ;;  %s588_s28 = scalar_lea.hbm %s989_s1, 256 }
  0x22   : > { %p589_p13 = scmp.lt.u32.totalorder %s778_s26, %s989_s1  ;;  %p590_p1 = scmp.lt.u32.totalorder %s588_s28, %s613_s22 }
  0x23   : > { %p586_p8 = pnand %p584_p7, %p572_p0  ;;  %p592_p3 = scmp.lt.u32.totalorder %s613_s22, %s778_s26 }
  0x24   : > { %p591_p2 = por %p590_p1, %p589_p13 }
  0x25   : > { %p587_p11 = pneg %p586_p8 }
  0x26   : > { %p593_p4 = por %p592_p3, %p591_p2 }
  0x28   : > { %p594_p10 = pnand %p593_p4, %p587_p11 }
  0x2a   : > { %597 = shalt.err (!%p594_p10)
}
  0x2b   : > { %s598_s3 = scalar_lea.vmem %s780_s23, 64  ;;  %p606_p5 = scmp.lt.s32.totalorder %s780_s23, %s780_s23 }
  0x2c   : > { %p599_p7 = scmp.ne.s32.totalorder %s780_s23, %s598_s3  ;;  %p607_p9 = scmp.lt.s32.totalorder %s598_s3, %s598_s3 }
  0x2e   : > { %p601_p8 = pnand %p599_p7, %p572_p0  ;;  %p608_p1 = por %p607_p9, %p606_p5 }
  0x30   : > { %p602_p6 = pneg %p601_p8 }
  0x32   : > { %p609_p13 = pnand %p608_p1, %p602_p6 }
  0x34   : > { %612 = shalt.err (!%p609_p13)
}
  0x35   : > { %s688_s4 = smov 128   ;;  %s689_s5 = smov 32  }
  0x36   : > { %s690_s6 = smov 2   ;;  %p998_p10 = scmp.ne.s32.totalorder %s996_s21, 0 }
  0x37   : > { %510 = dma.hbm_to_vmem [thread:$0]  (!%p784_p12), %s778_s26, 64, %s780_s23, [#allocation3], %s688_s4, %s689_s5, %s690_s6  }
  0x38   : > { %128 = sbr.rel (%p998_p10) target bundleno = 268 (0x10c), region = 28  ;;  %p999_p0 = scmp.eq.s32.totalorder (!%p998_p10), %s741_s13, 0 }
  0x3f   : > { %659 = dma.done.wait (%p999_p0), [#allocation5], 64   ;;  %p1000_p11 = pmov %p999_p0 }
  0x40   : > { %p1001_p5 = pmov %p999_p0 }
  0x41   : > { %661 = vsyncadd (%p1000_p11), [#allocation5], 4294967232 }
  0x42   : > { %663 = dma.done.wait (%p1001_p5), [#allocation3], 64   ;;  %p1002_p6 = pmov %p999_p0 }
  0x44   : > { %665 = vsyncadd (%p1002_p6), [#allocation3], 4294967232 }
  0x45   : > { %138 = sfence }
  0x46   : > { %v167_v0 = vlaneseq  ;;  %v691_v1 = vmov 0.0   ;;  %s692_s27 = smov 17   ;;  %s693_s23 = smov 15   ;;  %v159_v2 = vld [vmem:[#allocation6] sm:$0x3]  ;;  %vm204_vm0 = vcmask 138240  }
  0x47   : > { %198 = vrot.lane.b32.xlu0 %v691_v1, %s692_s27  ;;  %236 = vrot.lane.b32.xlu1 %v691_v1, %s693_s23  ;;  %v160_v3 = vld [vmem:[#allocation6 + $0x2] sm:$0x3]  ;;  %v694_v4 = vmov 1966171168   ;;  %s480_s21 = sld [smem:[#allocation2 + $0x1]]  ;;  %s695_s26 = smov 16  }
  0x48   : > { %v165_v5 = vunpack.c.l.s4 %v694_v4  ;;  %v168_v6 = vshrl.u32 %v167_v0, 7  ;;  %v163_v7 = vcombine.low %v159_v2, %v160_v3  ;;  %s696_s7 = smov 1   ;;  %s697_s8 = smov 127   ;;  %v189_v24 = vand.u32 127, %v167_v0 }
  0x49   : > { %s486_s14 = sld [smem:[#allocation2 + $0x101]]  ;;  %s698_s16 = smov 113   ;;  %vm242_vm2 = vcmask 121856   ;;  %vm229_vm4 = vcmask 130048   ;;  %vm260_vm7 = vcmask 7168   ;;  %vm283_vm8 = vcmask 1039360  }
  0x4a   : > { %v166_v8 = vunpack.c.0.s8 %v165_v5  ;;  %s699_s17 = smov 111   ;;  %s700_s22 = smov 112   ;;  %v190_v26 = vadd.s32 128, %v189_v24  ;;  %v191_v28 = vand.u32 15, %v189_v24  ;;  %vm301_vm9 = vcmask 924672  }
  0x4b   : > { %s870_s24 = sld [smem:[#allocation2]]  ;;  %s872_s25 = sld [smem:[#allocation2 + $0x2]]  ;;  %vm339_vm10 = vcmask 908288   ;;  %vm326_vm11 = vcmask 916480   ;;  %vm380_vm12 = vcmp.lt.s32.totalorder %v167_v0, 256 }
  0x4c   : > { %v844_v9 = vsub.s32 %v166_v8, %v168_v6  ;;  %v192_v30 = vand.u32 15, %v190_v26  ;;  %vm874_vm1 = vcmp.ge.s32.totalorder %v191_v28, 1  ;;  %s878_s28 = sld [smem:[#allocation2 + $0x81]]  ;;  %s880_s29 = sld [smem:[#allocation2 + $0x80]]  ;;  %vm889_vm5 = vcmp.lt.s32.totalorder %v191_v28, 15 }
  0x4d   : > { %v216_v14 = vstv %s480_s21  ;;  %s904_s30 = sld [smem:[#allocation2 + $0x82]]  ;;  %s917_s3 = sld [smem:[#allocation2 + $0x100]] }
  0x4e   : > { %v170_v10 = vrot.slane %v163_v7, %v844_v9  ;;  %v217_v15 = vmul.f32 0.0, %v216_v14  ;;  %vm882_vm3 = vcmp.ge.s32.totalorder %v192_v30, 1  ;;  %vm896_vm6 = vcmp.lt.s32.totalorder %v192_v30, 15  ;;  %s487_s4 = sld [smem:[#allocation2 + $0x102]]  ;;  %s147_s5 = sand.u32 1, %s676_s10  }
  0x4f   : > { %v313_v18 = vstv %s486_s14  ;;  %s479_s6 = sshll.u32 %s147_s5, 2  ;;  %p1011_p12 = scmp.ne.s32.totalorder %s994_s19, 0 }
  0x50   : > { %v848_v11 = vrot.slane %v170_v10, %v844_v9  ;;  %v171_v12 = vcombine.high %v170_v10, %v170_v10  ;;  %v316_v21 = vmul.f32 0.0, %v313_v18 }
  0x51   : > { %v211_v38 = vstv %s870_s24  ;;  %v249_v49 = vstv %s872_s25 }
  0x52   : > { %200 = vrot.lane.b32.xlu0 %v848_v11, %s692_s27  ;;  %v852_v13 = vrot.slane %v171_v12, %v844_v9  ;;  %v218_v16 = vmul.f32 %v216_v14, %v848_v11  ;;  %v314_v19 = vmul.f32 %v313_v18, %v848_v11  ;;  %v272_v54 = vstv %s878_s28 }
  0x53   : > { %v267_v56 = vstv %s880_s29  ;;  %v273_v63 = vmul.f32 %v272_v54, %v848_v11  ;;  %v308_v26 = vstv %s917_s3 }
  0x54   : > { %202 = vrot.lane.b32.xlu1 %v852_v13, %s692_s27  ;;  %v219_v17 = vmul.f32 %v216_v14, %v852_v13  ;;  %v315_v20 = vmul.f32 %v313_v18, %v852_v13  ;;  %v274_v12 = vmul.f32 %v272_v54, %v852_v13  ;;  %v290_v14 = vstv %s904_s30  ;;  %s493_s27 = sshll.u32 %s741_s13, 5  ;;  %s947_s13 = scalar_lea.sflag [#allocation4], %s147_s5 }
  0x55   : > { %v346_v32 = vstv %s487_s4 }
  0x56   : > { %238 = vrot.lane.b32.xlu0 %v848_v11, %s693_s23 }
  0x58   : > { %240 = vrot.lane.b32.xlu1 %v852_v13, %s693_s23  ;;  %s149_s23 = scalar_lea.vmem [#allocation7], %s479_s6 }
  0x59   : > { %s398_s21 = sshll.u32 %s149_s23, 4  ;;  %s944_s21 = int_to_ptr.vmem [resolvable:$true] %s398_s21 }
  0x5a   : > { %223 = vrot.lane.b32.xlu0 %v217_v15, %s695_s26  ;;  %s614_s14 = scalar_lea.vmem %s944_s21, 64 }
  0x5b   : > { %p615_p9 = scmp.ne.s32.totalorder %s944_s21, %s614_s14 }
  0x5c   : > { %225 = vrot.lane.b32.xlu1 %v218_v16, %s695_s26 }
  0x5d   : > { %p616_p2 = pnand %p615_p9, %p1011_p12 }
  0x5e   : > { %227 = vrot.lane.b32.xlu0 %v219_v17, %s695_s26 }
  0x5f   : > { %p617_p3 = pneg %p616_p2 }
  0x60   : > { %254 = vrot.lane.b32.xlu1 %v691_v1, %s696_s7 }
  0x62   : > { %256 = vrot.lane.b32.xlu0 %v848_v11, %s696_s7 }
  0x64   : > { %258 = vrot.lane.b32.xlu1 %v852_v13, %s696_s7 }
  0x66   : > { %277 = vrot.lane.b32.xlu0 %v848_v11, %s697_s8 }
  0x68   : > { %279 = vrot.lane.b32.xlu1 %v852_v13, %s697_s8 }
  0x6a   : > { %281 = vrot.lane.b32.xlu0 %v691_v1, %s697_s8  ;;  %s942_s8 = scalar_lea.hbm %s990_s2, %s493_s27 }
  0x6c   : > { %295 = vrot.lane.b32.xlu1 %v848_v11, %s698_s16 }
  0x6e   : > { %297 = vrot.lane.b32.xlu0 %v852_v13, %s698_s16 }
  0x70   : > { %299 = vrot.lane.b32.xlu1 %v691_v1, %s698_s16  ;;  %s701_s16 = smov [#allocation7]  }
  0x72   : > { %333 = vrot.lane.b32.xlu0 %v848_v11, %s699_s17 }
  0x74   : > { %335 = vrot.lane.b32.xlu1 %v852_v13, %s699_s17 }
  0x76   : > { %337 = vrot.lane.b32.xlu0 %v691_v1, %s699_s17  ;;  %s618_s17 = sshll.u32 %s701_s16, 4  ;;  %s619_s17 = int_to_ptr.vmem [resolvable:$false] %s618_s17 }
  0x77   : > { %p621_p4 = scmp.lt.s32.totalorder %s944_s21, %s619_s17 }
  0x78   : > { %320 = vrot.lane.b32.xlu1 %v314_v19, %s700_s22 }
  0x7a   : > { %322 = vrot.lane.b32.xlu0 %v315_v20, %s700_s22 }
  0x7c   : > { %324 = vrot.lane.b32.xlu1 %v316_v21, %s700_s22  ;;  %s620_s22 = scalar_lea.vmem %s619_s17, 128 }
  0x7d   : > { %p622_p7 = scmp.lt.s32.totalorder %s620_s22, %s614_s14 }
  0x7f   : > { %p623_p8 = por %p622_p7, %p621_p4 }
  0x81   : > { %p624_p1 = pnand %p623_p8, %p617_p3 }
  0xb9   : > { %v199_v22 = vpop.permute.xlu0 %198  ;;  %v237_v23 = vpop.permute.xlu1 %236 }
  0xc4   : > { %v201_v25 = vpop.permute.xlu0 %200 }
  0xc5   : > { %v205_v33 = vsel %vm204_vm0, %v199_v22, %v201_v25 }
  0xc6   : > { %v203_v27 = vpop.permute.xlu1 %202  ;;  %v209_v37 = vsel %vm874_vm1, %v205_v33, 0.0 }
  0xc7   : > { %v206_v36 = vsel %vm204_vm0, %v201_v25, %v203_v27  ;;  %v212_v45 = vmul.f32 %v211_v38, %v209_v37 }
  0xc8   : > { %v239_v29 = vpop.permute.xlu0 %238  ;;  %v210_v42 = vsel %vm882_vm3, %v206_v36, 0.0 }
  0xc9   : > { %v243_v41 = vsel %vm242_vm2, %v237_v23, %v239_v29  ;;  %v213_v52 = vmul.f32 %v211_v38, %v210_v42 }
  0xca   : > { %v241_v31 = vpop.permute.xlu1 %240  ;;  %v247_v48 = vsel %vm889_vm5, %v243_v41, 0.0 }
  0xcb   : > { %v244_v47 = vsel %vm242_vm2, %v239_v29, %v241_v31  ;;  %v250_v58 = vmul.f32 %v249_v49, %v247_v48 }
  0xcc   : > { %v224_v34 = vpop.permute.xlu0 %223  ;;  %v248_v55 = vsel %vm896_vm6, %v244_v47, 0.0 }
  0xcd   : > { %v251_v1 = vmul.f32 %v249_v49, %v248_v55 }
  0xce   : > { %v226_v39 = vpop.permute.xlu1 %225 }
  0xcf   : > { %v230_v43 = vsel %vm229_vm4, %v224_v34, %v226_v39 }
  0xd0   : > { %v228_v44 = vpop.permute.xlu0 %227  ;;  %v234_v53 = vadd.f32 %v230_v43, %v212_v45 }
  0xd1   : > { %v231_v50 = vsel %vm229_vm4, %v226_v39, %v228_v44 }
  0xd2   : > { %v255_v51 = vpop.permute.xlu1 %254  ;;  %v235_v59 = vadd.f32 %v231_v50, %v213_v52  ;;  %v252_v2 = vadd.f32 %v250_v58, %v234_v53 }
  0xd4   : > { %v257_v57 = vpop.permute.xlu0 %256  ;;  %v253_v7 = vadd.f32 %v251_v1, %v235_v59 }
  0xd5   : > { %v261_v60 = vsel %vm260_vm7, %v255_v51, %v257_v57 }
  0xd6   : > { %v265_v61 = vsel %vm874_vm1, %v261_v60, 0.0  ;;  %v259_v62 = vpop.permute.xlu1 %258 }
  0xd7   : > { %v268_v3 = vmul.f32 %v267_v56, %v265_v61  ;;  %v262_v4 = vsel %vm260_vm7, %v257_v57, %v259_v62 }
  0xd8   : > { %v266_v5 = vsel %vm882_vm3, %v262_v4, 0.0  ;;  %v278_v6 = vpop.permute.xlu0 %277 }
  0xd9   : > { %v270_v8 = vadd.f32 %v268_v3, %v252_v2  ;;  %v269_v10 = vmul.f32 %v267_v56, %v266_v5 }
  0xda   : > { %v280_v11 = vpop.permute.xlu1 %279 }
  0xdb   : > { %v271_v15 = vadd.f32 %v269_v10, %v253_v7  ;;  %v275_v16 = vadd.f32 %v273_v63, %v270_v8  ;;  %v284_v17 = vsel %vm283_vm8, %v278_v6, %v280_v11 }
  0xdc   : > { %v288_v18 = vsel %vm889_vm5, %v284_v17, 0.0  ;;  %v282_v19 = vpop.permute.xlu0 %281 }
  0xdd   : > { %v291_v20 = vmul.f32 %v290_v14, %v288_v18  ;;  %v276_v21 = vadd.f32 %v274_v12, %v271_v15  ;;  %v285_v22 = vsel %vm283_vm8, %v280_v11, %v282_v19 }
  0xde   : > { %v289_v23 = vsel %vm896_vm6, %v285_v22, 0.0  ;;  %v296_v24 = vpop.permute.xlu1 %295 }
  0xdf   : > { %v293_v25 = vadd.f32 %v291_v20, %v275_v16  ;;  %v292_v13 = vmul.f32 %v290_v14, %v289_v23 }
  0xe0   : > { %v298_v27 = vpop.permute.xlu0 %297 }
  0xe1   : > { %v294_v28 = vadd.f32 %v292_v13, %v276_v21  ;;  %v302_v29 = vsel %vm301_vm9, %v296_v24, %v298_v27 }
  0xe2   : > { %v306_v30 = vsel %vm874_vm1, %v302_v29, 0.0  ;;  %v300_v31 = vpop.permute.xlu1 %299 }
  0xe3   : > { %v309_v33 = vmul.f32 %v308_v26, %v306_v30  ;;  %v303_v34 = vsel %vm301_vm9, %v298_v27, %v300_v31 }
  0xe4   : > { %v307_v36 = vsel %vm882_vm3, %v303_v34, 0.0  ;;  %v334_v37 = vpop.permute.xlu0 %333 }
  0xe5   : > { %v310_v38 = vmul.f32 %v308_v26, %v307_v36  ;;  %v311_v39 = vadd.f32 %v309_v33, %v293_v25 }
  0xe6   : > { %v336_v41 = vpop.permute.xlu1 %335 }
  0xe7   : > { %v312_v42 = vadd.f32 %v310_v38, %v294_v28  ;;  %v340_v43 = vsel %vm339_vm10, %v334_v37, %v336_v41 }
  0xe8   : > { %v338_v44 = vpop.permute.xlu0 %337  ;;  %v344_v48 = vsel %vm889_vm5, %v340_v43, 0.0 }
  0xe9   : > { %v341_v45 = vsel %vm339_vm10, %v336_v41, %v338_v44  ;;  %v347_v51 = vmul.f32 %v346_v32, %v344_v48 }
  0xea   : > { %v321_v47 = vpop.permute.xlu1 %320  ;;  %v345_v35 = vsel %vm896_vm6, %v341_v45, 0.0 }
  0xeb   : > { %v348_v55 = vmul.f32 %v346_v32, %v345_v35 }
  0xec   : > { %v323_v49 = vpop.permute.xlu0 %322 }
  0xed   : > { %v327_v50 = vsel %vm326_vm11, %v321_v47, %v323_v49 }
  0xee   : > { %v331_v52 = vadd.f32 %v327_v50, %v311_v39  ;;  %v325_v53 = vpop.permute.xlu1 %324 }
  0xef   : > { %v328_v54 = vsel %vm326_vm11, %v323_v49, %v325_v53 }
  0xf0   : > { %v349_v56 = vadd.f32 %v347_v51, %v331_v52  ;;  %v332_v57 = vadd.f32 %v328_v54, %v312_v42 }
  0xf2   : > { %v350_v58 = vadd.f32 %v348_v55, %v332_v57 }
  0xf4   : > { %v353_v59 = vcombine.low %v349_v56, %v350_v58 }
  0xf6   : > { %v360_v40 = vrot.slane %v353_v59, %v844_v9 }
  0xf8   : > { %v361_v46 = vcombine.high %v360_v40, %v360_v40  ;;  %v368_v60 = vrot.slane %v360_v40, %v844_v9 }
  0xfa   : > { %v375_v61 = vrot.slane %v361_v46, %v844_v9  ;;  %382 = vst.msk [vmem:[%s149_s23] sm:$0x3] %vm380_vm12, %v368_v60 }
  0xfc   : > { %383 = vst.msk [vmem:[%s149_s23 + $0x2] sm:$0x3] %vm380_vm12, %v375_v61 }
  0xfd   : > { %627 = shalt.err (!%p624_p1)
}
  0xfe   : > { %s628_s24 = scalar_lea.hbm %s942_s8, 64  ;;  %s632_s29 = scalar_lea.hbm %s990_s2, 256 }
  0xff   : > { %p629_p13 = scmp.ne.s32.totalorder %s942_s8, %s628_s24  ;;  %p633_p11 = scmp.lt.u32.totalorder %s942_s8, %s990_s2 }
 0x100   : > { %p634_p5 = scmp.lt.u32.totalorder %s632_s29, %s628_s24  ;;  %p636_p9 = scmp.lt.u32.totalorder %s628_s24, %s942_s8 }
 0x101   : > { %p630_p10 = pnand %p629_p13, %p1011_p12 }
 0x102   : > { %p635_p6 = por %p634_p5, %p633_p11 }
 0x103   : > { %p631_p0 = pneg %p630_p10 }
 0x104   : > { %p637_p2 = por %p636_p9, %p635_p6 }
 0x106   : > { %p638_p3 = pnand %p637_p2, %p631_p0 }
 0x108   : > { %641 = shalt.err (!%p638_p3)
}
 0x109   : > { %s702_s4 = smov 32   ;;  %s703_s5 = smov 128  }
 0x10a   : > { %s704_s6 = smov 2  }
 0x10b   : > { %502 = dma.vmem_to_hbm [thread:$0]  (%p1011_p12), %s944_s21, 64, %s942_s8, %s947_s13, %s702_s4, %s703_s5, %s704_s6  }
 0x10c PF: > { %p519_p4 = scmp.ge.s32.totalorder %s684_s12, 2  ;;  %s413_s27 = sand.u32 1, %s672_s9  }
 0x10d   : > { %p1012_p7 = scmp.ne.s32.totalorder %s995_s20, 0  ;;  %s414_s23 = scalar_lea.sflag [#allocation4], %s413_s27 }
 0x10f   : > { %p512_p8 = pnand %p519_p4, %p1012_p7 }
 0x111   : > { %667 = dma.done.wait (!%p512_p8), %s414_s23, 64  }
 0x112   : > { %669 = vsyncadd (!%p512_p8), %s414_s23, 4294967232  ;;  %p14_p1 = scmp.ge.s32.totalorder %s745_s15, 6   ;;  %s1013_s9 = smov %s676_s10 }
 0x113   : > { %s1014_s10 = smov %s680_s11  ;;  %s1015_s11 = smov %s756_s18 }
 0x114   : > { %s1016_s12 = smov %s745_s15  ;;  %16 = sbr.rel (!%p14_p1) target bundleno = 5 (0x5), region = 71 }
 0x11b   :  { %419 = vsyncpa [#allocation3], 1 }
 0x11c   :  { %421 = vsyncpa [#allocation3 + $0x1], 1 }
 0x11d   :  { %422 = vsyncpa [#allocation4], 1 }
 0x11e   :  { %424 = vsyncpa [#allocation4 + $0x1], 1 }
 0x11f   :  { %425 = vsyncpa [#allocation5], 1 }
 0x120   :  { %427 = vsyncpa [#allocation5 + $0x1], 1 }

</bundles_post_ra>
